<compile_context>
chip_gen: v6e
topology: v6e:2x2x1
jax: 0.10.0
libtpu: 0.0.40
codegen_flags: <defaults>
</compile_context>

<pallas_src>
import functools

import jax
import jax.numpy as jnp
import numpy as np
from jax.experimental import pallas as pl
from jax.experimental.pallas import tpu as pltpu


def _attn_kernel(x_ref, wab_ref, bab_ref, wct_ref, bout_ref, out_ref,
                 *, hd, inv_h, act_dtype):
    # x_ref   : (TILE_K, L)    f32  (cast to bf16 in-kernel)
    # wab_ref : (L, 2*H*D)     bf16  [Wa^T | Wb^T]
    # bab_ref : (1, 2*H*D)     f32   [ba | bb]
    # wct_ref : (C, H*D)       bf16  Wc_t[c, h*D+d] = Wc[h, c, d]
    # bout_ref: (C, 1)         f32   sum_h bc / H
    # out_ref : (C, TILE_K)    f32   lane-dense (transposed) output tile
    x = x_ref[...].astype(jnp.bfloat16)                         # in-kernel cast (VPU)
    ab = jnp.dot(x, wab_ref[...],
                 preferred_element_type=jnp.float32) + bab_ref[...]  # f32 acc + bias
    ab = ab.astype(act_dtype)                                   # bf16 on v6e/v7x, f32 on v5e
    a = jnp.tanh(ab[:, :hd])                                    # EUP
    b = jax.nn.sigmoid(ab[:, hd:])                              # EUP
    gated = (a * b).astype(jnp.bfloat16)                        # (TILE_K, H*D) MXU operand
    # Lane-dense result: out_t[c, k] = sum_d Wc_t[c, d] * gated[k, d]
    out_t = jnp.einsum('cd,kd->ck', wct_ref[...], gated,
                       preferred_element_type=jnp.float32)      # (C, TILE_K) f32
    out_ref[...] = out_t * inv_h + bout_ref[...]                # 1/H head-mean in f32 epilogue


def _bf16_activations_ok():
    """bf16 VPU/EUP exists on v6e/v7x; keep activations f32 on v5e and older."""
    try:
        kind = jax.devices()[0].device_kind.lower()
    except Exception:
        return False
    return any(tag in kind for tag in ("v6", "v7", "7x"))


def _pick_tile_k(K, requested):
    """tile_k must be a multiple of 128 (it is the lane dim of the transposed
    output).  Cap it so the grid has >= 2 steps when K allows, so both v7x
    TensorCores get work under dimension_semantics=("parallel",)."""
    t = max(128, (int(requested) // 128) * 128)
    half = pl.cdiv(pl.cdiv(K, 2), 128) * 128
    return min(t, max(128, half))


def _vmem_limit_bytes(tile_k, L, C, hd):
    """Scoped-VMEM budget: double-buffered x/out tiles + f32 working set +
    resident weights; clamped to stay valid on v7x (64 MiB physical / TC)."""
    pad = lambda v, m: -(-v // m) * m
    x_blk = tile_k * pad(L, 128) * 4              # f32 x tile (lane-padded 32->128)
    out_blk = pad(C, 8) * tile_k * 4              # lane-dense out tile (sublane-padded 2->8)
    interm = 4 * tile_k * pad(2 * hd, 128) * 4    # ab / a / b / gated working set (generous)
    resident = 1 << 20                            # weights, biases, compiler scratch
    need = 2 * (x_blk + out_blk) + interm + resident
    return int(min(max(need, 16 << 20), 48 << 20))


def prepare_params(wa, ba, wb, bb, wc, bc, *, num_heads):
    """One-time transform of PyTorch-layout parameters into kernel layouts.

    wa, wb : (D*H, L)   nn.Linear weights
    ba, bb : (D*H,)
    wc     : (H, C, D)  Parallel_Linear weight
    bc     : (H, C)     Parallel_Linear bias
    """
    H, C, D = wc.shape
    assert H == num_heads and wa.shape[0] == D * H and wb.shape == wa.shape
    wab = jnp.concatenate([wa.T, wb.T], axis=1).astype(jnp.bfloat16)        # (L, 2HD)
    bab = jnp.concatenate([ba, bb]).reshape(1, 2 * D * H).astype(jnp.float32)
    # Per-head linear folded into a single (C, H*D) matrix; 1/H is NOT folded
    # into the bf16 weight — it is applied in the f32 epilogue inside the kernel.
    wct = jnp.transpose(wc, (1, 0, 2)).reshape(C, H * D).astype(jnp.bfloat16)  # (C, HD)
    bout = (jnp.sum(bc, axis=0) / num_heads).astype(jnp.float32).reshape(C, 1)
    inv_h = 1.0 / float(num_heads)
    return wab, bab, wct, bout, inv_h


def attn_net_parallel_fast(x, wab, bab, wct, bout, inv_h, *, tile_k=2048):
    """Forward of Attn_Net_Parallel_Fast. Returns (A_avg (K, C), x)."""
    K, L = x.shape
    C, hd = wct.shape

    tile_k = _pick_tile_k(K, tile_k)
    grid_k = pl.cdiv(K, tile_k)                      # ragged tail handled by Pallas clipping
    act_dtype = jnp.bfloat16 if _bf16_activations_ok() else jnp.float32

    const2 = lambda i: (0, 0)                        # resident operands: never re-DMA'd

    cost = pl.CostEstimate(
        flops=int(2 * K * L * (2 * hd) + 2 * K * hd * C),
        transcendentals=int(2 * K * hd),
        bytes_accessed=int(K * L * 4 + K * C * 4
                           + wab.size * 2 + bab.size * 4
                           + wct.size * 2 + bout.size * 4),
    )

    out_t = pl.pallas_call(
        functools.partial(_attn_kernel, hd=hd, inv_h=inv_h, act_dtype=act_dtype),
        out_shape=jax.ShapeDtypeStruct((C, K), jnp.float32),
        grid_spec=pltpu.PrefetchScalarGridSpec(
            num_scalar_prefetch=0,
            grid=(grid_k,),
            in_specs=[
                pl.BlockSpec((tile_k, L), lambda i: (i, 0)),   # x tile (pipelined, f32)
                pl.BlockSpec((L, 2 * hd), const2),             # [Wa^T | Wb^T]   (resident)
                pl.BlockSpec((1, 2 * hd), const2),             # [ba | bb]       (resident)
                pl.BlockSpec((C, hd), const2),                 # Wc_t            (resident)
                pl.BlockSpec((C, 1), const2),                  # sum_h bc / H    (resident)
            ],
            out_specs=pl.BlockSpec((C, tile_k), lambda i: (0, i)),  # lane-dense output
        ),
        compiler_params=pltpu.CompilerParams(
            dimension_semantics=("parallel",),                 # megacore-shard K on v7x
            vmem_limit_bytes=_vmem_limit_bytes(tile_k, L, C, hd),
        ),
        cost_estimate=cost,
    )(x, wab, bab, wct, bout)

    # Tiny (C, K) -> (K, C) transpose to preserve the module's output contract.
    return out_t.T, x


def reference_forward(x, wa, ba, wb, bb, wc, bc, num_heads):
    """Pure-JAX f32 reference matching the PyTorch module exactly."""
    K = x.shape[0]
    a = jnp.tanh(x @ wa.T + ba)
    b = jax.nn.sigmoid(x @ wb.T + bb)
    A = (a * b).reshape(K, num_heads, -1)               # (K, H, D)
    A = jnp.einsum('khd,hcd->khc', A, wc) + bc[None]    # (K, H, C)
    return jnp.mean(A, axis=1), x                       # (K, C)


if __name__ == "__main__":
    # Small shapes consistent with the module (L, D, num_heads, n_classes, K).
    L, D, H, C, K = 32, 16, 4, 2, 300

    key = jax.random.PRNGKey(0)
    k1, k2, k3, k4, k5, k6, k7 = jax.random.split(key, 7)

    bound_a = 1.0 / np.sqrt(L)
    wa = jax.random.uniform(k1, (D * H, L), jnp.float32, -bound_a, bound_a)
    ba = jax.random.uniform(k2, (D * H,), jnp.float32, -bound_a, bound_a)
    wb = jax.random.uniform(k3, (D * H, L), jnp.float32, -bound_a, bound_a)
    bb = jax.random.uniform(k4, (D * H,), jnp.float32, -bound_a, bound_a)
    bound_c = 1.0 / np.sqrt(D)
    wc = jax.random.uniform(k5, (H, C, D), jnp.float32, -bound_c, bound_c)
    bc = jax.random.uniform(k6, (H, C), jnp.float32, -bound_c, bound_c)

    x = jax.random.normal(k7, (K, L), jnp.float32)

    # Parameter layouts prepared once (hoisted out of the per-call path).
    params = prepare_params(wa, ba, wb, bb, wc, bc, num_heads=H)

    # tile_k is auto-capped to 256 here (K=300) -> 2 grid steps, ragged tail
    # on the second block exercises the cdiv-grid / last-block clipping path.
    A_avg, x_out = attn_net_parallel_fast(x, *params, tile_k=2048)
    A_avg = jax.block_until_ready(A_avg)
    x_out = jax.block_until_ready(x_out)

    A_ref, _ = reference_forward(x, wa, ba, wb, bb, wc, bc, H)
    # Looser tolerance for the bf16 MXU/activation path (f32 accumulation).
    np.testing.assert_allclose(np.asarray(A_avg), np.asarray(A_ref),
                               rtol=3e-2, atol=3e-2)
    assert A_avg.shape == (K, C) and x_out.shape == (K, L)
    np.testing.assert_allclose(np.asarray(x_out), np.asarray(x))

    print("KERNEL_OK")
</pallas_src>

<mosaic_0001>
module attributes {stable_mosaic.version = 11 : i64} {
  func.func @_attn_kernel(%arg0: i32, %arg1: memref<256x32xf32, #tpu.memory_space<vmem>>, %arg2: memref<32x128xbf16, #tpu.memory_space<vmem>>, %arg3: memref<1x128xf32, #tpu.memory_space<vmem>>, %arg4: memref<2x64xbf16, #tpu.memory_space<vmem>>, %arg5: memref<2x1xf32, #tpu.memory_space<vmem>>, %arg6: memref<2x256xf32, #tpu.memory_space<vmem>>) attributes {dimension_semantics = [#tpu.dimension_semantics<parallel>], iteration_bounds = array<i64: 2>, scalar_prefetch = 0 : i64, scratch_operands = 0 : i64, tpu.core_type = #tpu.core_type<tc>, window_params = [{transform_indices = @transform_0, window_bounds = array<i64: 256, 32>}, {pipeline_mode = #tpu.pipeline_mode<synchronous>, transform_indices = @transform_1, window_bounds = array<i64: 32, 128>}, {pipeline_mode = #tpu.pipeline_mode<synchronous>, transform_indices = @transform_2, window_bounds = array<i64: 1, 128>}, {pipeline_mode = #tpu.pipeline_mode<synchronous>, transform_indices = @transform_3, window_bounds = array<i64: 2, 64>}, {pipeline_mode = #tpu.pipeline_mode<synchronous>, transform_indices = @transform_4, window_bounds = array<i64: 2, 1>}, {transform_indices = @transform_5, window_bounds = array<i64: 2, 256>}]} {
    %c0 = arith.constant 0 : index
    %c0_0 = arith.constant 0 : index
    %0 = vector.load %arg1[%c0, %c0_0] : memref<256x32xf32, #tpu.memory_space<vmem>>, vector<256x32xf32>
    %1 = arith.truncf %0 : vector<256x32xf32> to vector<256x32xbf16>
    %c0_1 = arith.constant 0 : index
    %c0_2 = arith.constant 0 : index
    %2 = vector.load %arg2[%c0_1, %c0_2] : memref<32x128xbf16, #tpu.memory_space<vmem>>, vector<32x128xbf16>
    %cst = arith.constant dense<0.000000e+00> : vector<256x128xf32>
    %3 = tpu.matmul %1, %2, %cst {dimension_numbers = #tpu.dot_dimension_numbers<[1], [0], [0], [1], [0, 0, 1, 1], [], []>} : vector<256x32xbf16>, vector<32x128xbf16>, vector<256x128xf32> -> vector<256x128xf32>
    %c0_3 = arith.constant 0 : index
    %c0_4 = arith.constant 0 : index
    %4 = vector.load %arg3[%c0_3, %c0_4] : memref<1x128xf32, #tpu.memory_space<vmem>>, vector<1x128xf32>
    %5 = vector.broadcast %4 : vector<1x128xf32> to vector<256x128xf32>
    %6 = arith.addf %3, %5 : vector<256x128xf32>
    %7 = vector.extract_strided_slice %6 {offsets = [0, 0], sizes = [256, 64], strides = [1, 1]} : vector<256x128xf32> to vector<256x64xf32>
    %8 = math.tanh %7 : vector<256x64xf32>
    %9 = vector.extract_strided_slice %6 {offsets = [0, 64], sizes = [256, 64], strides = [1, 1]} : vector<256x128xf32> to vector<256x64xf32>
    %10 = arith.negf %9 : vector<256x64xf32>
    %11 = math.exp %10 : vector<256x64xf32>
    %cst_5 = arith.constant 1.000000e+00 : f32
    %12 = vector.broadcast %cst_5 : f32 to vector<256x64xf32>
    %13 = arith.addf %12, %11 : vector<256x64xf32>
    %14 = arith.divf %12, %13 : vector<256x64xf32>
    %15 = arith.mulf %8, %14 : vector<256x64xf32>
    %16 = arith.truncf %15 : vector<256x64xf32> to vector<256x64xbf16>
    %c0_6 = arith.constant 0 : index
    %c0_7 = arith.constant 0 : index
    %17 = vector.load %arg4[%c0_6, %c0_7] : memref<2x64xbf16, #tpu.memory_space<vmem>>, vector<2x64xbf16>
    "tpu.trace_start"() <{level = 10 : i32, message = "cd,kd->ck"}> : () -> ()
    %cst_8 = arith.constant dense<0.000000e+00> : vector<2x256xf32>
    %18 = tpu.matmul %17, %16, %cst_8 {dimension_numbers = #tpu.dot_dimension_numbers<[1], [1], [0], [0], [0, 0, 1, 0], [], []>} : vector<2x64xbf16>, vector<256x64xbf16>, vector<2x256xf32> -> vector<2x256xf32>
    "tpu.trace_stop"() : () -> ()
    %cst_9 = arith.constant 2.500000e-01 : f32
    %19 = vector.broadcast %cst_9 : f32 to vector<2x256xf32>
    %20 = arith.mulf %18, %19 : vector<2x256xf32>
    %c0_10 = arith.constant 0 : index
    %c0_11 = arith.constant 0 : index
    %21 = vector.load %arg5[%c0_10, %c0_11] : memref<2x1xf32, #tpu.memory_space<vmem>>, vector<2x1xf32>
    %22 = vector.broadcast %21 : vector<2x1xf32> to vector<2x256xf32>
    %23 = arith.addf %20, %22 : vector<2x256xf32>
    %c0_12 = arith.constant 0 : index
    %c0_13 = arith.constant 0 : index
    %24 = vector.load %arg6[%c0_12, %c0_13] : memref<2x256xf32, #tpu.memory_space<vmem>>, vector<2x256xf32>
    tpu.vector_store %arg6[%c0_12, %c0_13], %23 {strides = array<i32>} : memref<2x256xf32, #tpu.memory_space<vmem>>, vector<2x256xf32>,
    return
  }
  func.func @transform_0(%arg0: i32) -> (i32, i32) {
    %c0_i32 = arith.constant 0 : i32
    %c0_i32_0 = arith.constant 0 : i32
    return %arg0, %c0_i32 : i32, i32
  }
  func.func @transform_1(%arg0: i32) -> (i32, i32) {
    %c0_i32 = arith.constant 0 : i32
    %c0_i32_0 = arith.constant 0 : i32
    %c0_i32_1 = arith.constant 0 : i32
    return %c0_i32, %c0_i32_0 : i32, i32
  }
  func.func @transform_2(%arg0: i32) -> (i32, i32) {
    %c0_i32 = arith.constant 0 : i32
    %c0_i32_0 = arith.constant 0 : i32
    %c0_i32_1 = arith.constant 0 : i32
    return %c0_i32, %c0_i32_0 : i32, i32
  }
  func.func @transform_3(%arg0: i32) -> (i32, i32) {
    %c0_i32 = arith.constant 0 : i32
    %c0_i32_0 = arith.constant 0 : i32
    %c0_i32_1 = arith.constant 0 : i32
    return %c0_i32, %c0_i32_0 : i32, i32
  }
  func.func @transform_4(%arg0: i32) -> (i32, i32) {
    %c0_i32 = arith.constant 0 : i32
    %c0_i32_0 = arith.constant 0 : i32
    %c0_i32_1 = arith.constant 0 : i32
    return %c0_i32, %c0_i32_0 : i32, i32
  }
  func.func @transform_5(%arg0: i32) -> (i32, i32) {
    %c0_i32 = arith.constant 0 : i32
    %c0_i32_0 = arith.constant 0 : i32
    return %c0_i32, %arg0 : i32, i32
  }
}

</mosaic_0001>

<bundles_post_ra>
// kernel: tpu_custom_call.1
= control target key start
LH: loop header
LB: loop body
LE: loop exit
PB: predicated region body
PF: predicated region fallthrough
CT: control target
= control target key end

     0   :  { %10 = vsyncpa [#allocation3], 0  ;;  %s2004_s0 = inlined_call_operand.vmem [shape: f32[300,32], index: 0, kind: input, shape index: {}]   ;;  %s2005_s1 = inlined_call_operand.vmem [shape: bf16[32,128], index: 1, kind: input, shape index: {}]   ;;  %s2006_s2 = inlined_call_operand.vmem [shape: f32[1,128], index: 2, kind: input, shape index: {}]   ;;  %s2007_s3 = inlined_call_operand.vmem [shape: bf16[2,64], index: 3, kind: input, shape index: {}]   ;;  %s2008_s4 = inlined_call_operand.vmem [shape: f32[2,1], index: 4, kind: input, shape index: {}]   ;;  %s2009_s5 = inlined_call_operand.hbm [shape: f32[2,300], index: 5, kind: output, shape index: {}]  }
   0x1   :  { %12 = vsyncpa [#allocation3 + $0x1], 0  ;;  %s1608_s18 = smov 0   ;;  %s1610_s19 = smov 0  }
   0x2   :  { %s1612_s20 = smov 0   ;;  %s1614_s21 = smov 0  }
   0x3 LB: > { %s1629_s22 = sadd.s32 4294967295, %s1573_s21   ;;  %s1128_s23 = sadd.s32 4294967294, %s1573_s21   ;;  %s1573_s21 = sphi %s1614_s21, %s2015_s21   ;;  %s1569_s20 = sphi %s1612_s20, %s2014_s20   ;;  %s1565_s19 = sphi %s1610_s19, %s2013_s19   ;;  %s1561_s18 = sphi %s1608_s18, %s2012_s18  }
   0x4   : > { %s1633_s24 = sadd.s32 1, %s1573_s21   ;;  %s135_s25 = sadd.s32 1, %s1569_s20 }
   0x5   : > { %s132_s26 = ssub.s32 %s1573_s21, %s1633_s24  ;;  %p145_p0 = scmp.ne.s32.totalorder %s1569_s20, %s1565_s19 }
   0x6   : > { %p133_p1 = scmp.eq.s32.totalorder %s132_s26, 0  ;;  %p146_p2 = scmp.eq.s32.totalorder %s1629_s22, 1 }
   0x7   : > { %p151_p3 = scmp.ne.s32.totalorder %s1565_s19, %s1561_s18  ;;  %p152_p4 = scmp.eq.s32.totalorder %s1128_s23, 1 }
   0x8   : > { %s1644_s27 = scalar_select %p133_p1, %s1569_s20, %s135_s25  }
   0x9   : > { %p1646_p5 = por %p146_p2, %p145_p0  ;;  %p1650_p6 = por %p152_p4, %p151_p3 }
   0xa   : > { %p1131_p7 = scmp.ge.s32.totalorder %s1573_s21, 1  ;;  %p199_p8 = scmp.lt.s32.totalorder %s1573_s21, 3 }
   0xc   : > { %p200_p9 = pnand %p1131_p7, %p199_p8 }
   0xd   : > { %s1133_s7 = sshll.u32 (!%p200_p9), %s1629_s22, 5  ;;  %s1575_s16 = smov (!%p200_p9), 64  }
   0xe   : > { %203 = sbr.rel (%p200_p9) target bundleno = 728 (0x2d8), region = 40  ;;  %p236_p10 = scmp.lt.s32.totalorder (!%p200_p9), %s1133_s7, 37 }
   0xf   : > { %s228_s30 = sand.u32 (!%p200_p9), 1, %s1565_s19  }
  0x10   : > { %s1132_s6 = sshll.u32 (!%p200_p9), %s228_s30, 2  ;;  %s1957_s8 = scalar_lea.sflag (!%p200_p9), [#allocation3], %s228_s30 }
  0x13   : > { %v1319_v0 = vld [vmem:[%s2005_s1 + $0x8] sm:$0xff]   ;;  %v1320_v1 = vld [vmem:[%s2005_s1] sm:$0xff]   ;;  %s2017_s7 = smov (!%p236_p10, %s1133_s7), 37  ;;  %vm322_vm0 = vcmask 261120   ;;  %vm933_vm1 = vcmask 523264   ;;  %s1189_s9 = sshll.u32 (%p1646_p5), %s1629_s22, 1 }
  0x14   : > { %1234 = vmatprep.subr.bf16.mxu0 %v1319_v0  ;;  %s1134_s10 = sshll.u32 %s2017_s7, 3  ;;  %v1719_v50 = vld [vmem:[%s2006_s2] ss:$0 sm:$0xff]  ;;  %s230_s7 = scalar_lea.vmem [#allocation2], %s1132_s6 }
  0x15   : > { %1235 = vmatpush3.bf16.msra.mxu0 %v1319_v0  ;;  %s1666_s13 = scalar_lea.vmem %s2004_s0, %s1134_s10  ;;  %s1057_s10 = ssub.s32 (%p1646_p5), 3, %s1189_s9 }
  0x16   : > { %1236 = vmatprep.subr.bf16.mxu0 %v1320_v1  ;;  %v251_v2 = vld [vmem:[%s1666_s13] sm:$0xff]  ;;  %v252_v3 = vld [vmem:[%s1666_s13 + $0x8] sm:$0xff]  ;;  %v253_v4 = vld [vmem:[%s1666_s13 + $0x10] sm:$0xff]  ;;  %p1058_p11 = scmp.lt.s32.totalorder (%p1646_p5), %s1057_s10, 2 }
  0x17   : > { %v283_v5 = vpack.c.bf16 %v252_v3, %v251_v2  ;;  %v254_v6 = vld [vmem:[%s1666_s13 + $0x18] sm:$0xff]  ;;  %v255_v7 = vld [vmem:[%s1666_s13 + $0x20] sm:$0xff]  ;;  %v256_v8 = vld [vmem:[%s1666_s13 + $0x28] sm:$0xff] }
  0x18   : > { %v284_v9 = vpack.c.bf16 %v254_v6, %v253_v4  ;;  %v285_v10 = vpack.c.bf16 %v256_v8, %v255_v7  ;;  %v257_v11 = vld [vmem:[%s1666_s13 + $0x30] sm:$0xff]  ;;  %v258_v12 = vld [vmem:[%s1666_s13 + $0x38] sm:$0xff]  ;;  %v259_v13 = vld [vmem:[%s1666_s13 + $0x40] sm:$0xff] }
  0x19   : > { %1237 = vmatpush3.bf16.msra.mxu0 %v1320_v1  ;;  %1238 = vmatprep.mubr.msk.bf16.mxu0 %vm322_vm0, %v283_v5  ;;  %v260_v14 = vld [vmem:[%s1666_s13 + $0x48] sm:$0xff]  ;;  %v286_v15 = vpack.c.bf16 %v258_v12, %v257_v11  ;;  %v261_v17 = vld [vmem:[%s1666_s13 + $0x50] sm:$0xff]  ;;  %v262_v18 = vld [vmem:[%s1666_s13 + $0x58] sm:$0xff] }
  0x1a   : > { %v287_v16 = vpack.c.bf16 %v260_v14, %v259_v13  ;;  %v263_v19 = vld [vmem:[%s1666_s13 + $0x60] sm:$0xff]  ;;  %v264_v20 = vld [vmem:[%s1666_s13 + $0x68] sm:$0xff]  ;;  %v288_v21 = vpack.c.bf16 %v262_v18, %v261_v17  ;;  %v265_v23 = vld [vmem:[%s1666_s13 + $0x70] sm:$0xff] }
  0x1b   : > { %v289_v22 = vpack.c.bf16 %v264_v20, %v263_v19  ;;  %v266_v24 = vld [vmem:[%s1666_s13 + $0x78] sm:$0xff]  ;;  %v267_v25 = vld [vmem:[%s1666_s13 + $0x80] sm:$0xff]  ;;  %v268_v26 = vld [vmem:[%s1666_s13 + $0x88] sm:$0xff] }
  0x1c   : > { %1239 = vmatmul.mubr.msk.bf16.vlgmr.msra.gmra.mxu0 %vm322_vm0, %v284_v9  ;;  %v290_v27 = vpack.c.bf16 %v266_v24, %v265_v23  ;;  %v291_v28 = vpack.c.bf16 %v268_v26, %v267_v25  ;;  %v269_v29 = vld [vmem:[%s1666_s13 + $0x90] sm:$0xff]  ;;  %v270_v30 = vld [vmem:[%s1666_s13 + $0x98] sm:$0xff]  ;;  %v271_v31 = vld [vmem:[%s1666_s13 + $0xa0] sm:$0xff] }
  0x1d   : > { %1242 = vmatprep.mubr.msk.bf16.mxu0 %vm322_vm0, %v285_v10  ;;  %v272_v32 = vld [vmem:[%s1666_s13 + $0xa8] sm:$0xff]  ;;  %v292_v33 = vpack.c.bf16 %v270_v30, %v269_v29  ;;  %v273_v35 = vld [vmem:[%s1666_s13 + $0xb0] sm:$0xff]  ;;  %v274_v36 = vld [vmem:[%s1666_s13 + $0xb8] sm:$0xff] }
  0x1e   : > { %v293_v34 = vpack.c.bf16 %v272_v32, %v271_v31  ;;  %v275_v37 = vld [vmem:[%s1666_s13 + $0xc0] sm:$0xff]  ;;  %v276_v38 = vld [vmem:[%s1666_s13 + $0xc8] sm:$0xff]  ;;  %v294_v39 = vpack.c.bf16 %v274_v36, %v273_v35  ;;  %v277_v41 = vld [vmem:[%s1666_s13 + $0xd0] sm:$0xff] }
  0x1f   : > { %v295_v40 = vpack.c.bf16 %v276_v38, %v275_v37  ;;  %v278_v42 = vld [vmem:[%s1666_s13 + $0xd8] sm:$0xff]  ;;  %v279_v43 = vld [vmem:[%s1666_s13 + $0xe0] sm:$0xff]  ;;  %v280_v44 = vld [vmem:[%s1666_s13 + $0xe8] sm:$0xff] }
  0x20   : > { %v296_v45 = vpack.c.bf16 %v278_v42, %v277_v41  ;;  %v297_v46 = vpack.c.bf16 %v280_v44, %v279_v43  ;;  %v281_v47 = vld [vmem:[%s1666_s13 + $0xf0] sm:$0xff]  ;;  %v282_v48 = vld [vmem:[%s1666_s13 + $0xf8] sm:$0xff] }
  0x21   : > { %v298_v49 = vpack.c.bf16 %v282_v48, %v281_v47 }
  0x24   : > { %1243 = vmatmul.mubr.msk.bf16.gmra.mxu0 %vm322_vm0, %v286_v15 }
  0x25   : > { %1246 = vmatprep.mubr.msk.bf16.mxu0 %vm322_vm0, %v287_v16 }
  0x2c   : > { %1247 = vmatmul.mubr.msk.bf16.gmra.mxu0 %vm322_vm0, %v288_v21 }
  0x2d   : > { %1250 = vmatprep.mubr.msk.bf16.mxu0 %vm322_vm0, %v289_v22 }
  0x34   : > { %1251 = vmatmul.mubr.msk.bf16.gmra.mxu0 %vm322_vm0, %v290_v27 }
  0x35   : > { %1254 = vmatprep.mubr.msk.bf16.mxu0 %vm322_vm0, %v291_v28 }
  0x3c   : > { %1255 = vmatmul.mubr.msk.bf16.gmra.mxu0 %vm322_vm0, %v292_v33 }
  0x3d   : > { %1258 = vmatprep.mubr.msk.bf16.mxu0 %vm322_vm0, %v293_v34 }
  0x44   : > { %1259 = vmatmul.mubr.msk.bf16.gmra.mxu0 %vm322_vm0, %v294_v39 }
  0x45   : > { %1262 = vmatprep.mubr.msk.bf16.mxu0 %vm322_vm0, %v295_v40 }
  0x4c   : > { %1263 = vmatmul.mubr.msk.bf16.gmra.mxu0 %vm322_vm0, %v296_v45 }
  0x4d   : > { %1266 = vmatprep.mubr.msk.bf16.mxu0 %vm322_vm0, %v297_v46 }
  0x54   : > { %1267 = vmatmul.mubr.msk.bf16.gmra.mxu0 %vm322_vm0, %v298_v49 }
  0xdc   : > { %v1240_v51 = vpop.f32.mrf.mxu0 }
  0xdd   : > { %v1722_v52 = vadd.f32 %v1240_v51, %v1719_v50 }
  0xde   : > { %v405_v53 = vpop.f32.mrf.mxu0 }
  0xdf   : > { %v1725_v54 = vadd.f32 %v1719_v50, %v405_v53 }
  0xe0   : > { %v1241_v55 = vpop.f32.mrf.mxu0 }
  0xe1   : > { %v1728_v56 = vadd.f32 %v1241_v55, %v1719_v50 }
  0xe2   : > { %v408_v57 = vpop.f32.mrf.mxu0 }
  0xe3   : > { %v1731_v58 = vadd.f32 %v1719_v50, %v408_v57 }
  0xe4   : > { %v1244_v59 = vpop.f32.mrf.mxu0 }
  0xe5   : > { %v1734_v60 = vadd.f32 %v1244_v59, %v1719_v50 }
  0xe6   : > { %v421_v61 = vpop.f32.mrf.mxu0 }
  0xe7   : > { %v1737_v62 = vadd.f32 %v1719_v50, %v421_v61 }
  0xe8   : > { %v1245_v63 = vpop.f32.mrf.mxu0 }
  0xe9   : > { %v1740_v0 = vadd.f32 %v1245_v63, %v1719_v50 }
  0xea   : > { %v424_v1 = vpop.f32.mrf.mxu0 }
  0xeb   : > { %v1743_v2 = vadd.f32 %v1719_v50, %v424_v1 }
  0xec   : > { %v1248_v3 = vpop.f32.mrf.mxu0 }
  0xed   : > { %v1791_v47 = vadd.f32 %v1248_v3, %v1719_v50 }
  0xee   : > { %v1745_v4 = vpop.f32.mrf.mxu0 }
  0xef   : > { %v1164_v53 = vmul.f32 -1.442695, %v1791_v47  ;;  %v1811_v1 = vadd.f32 %v1719_v50, %v1745_v4 }
  0xf0   : > { %v1249_v5 = vpop.f32.mrf.mxu0 }
  0xf1   : > { %v1748_v6 = vadd.f32 %v1249_v5, %v1719_v50 }
  0xf2   : > { %v440_v7 = vpop.f32.mrf.mxu0 }
  0xf3   : > { %v1751_v8 = vadd.f32 %v1719_v50, %v440_v7 }
  0xf4   : > { %v1252_v9 = vpop.f32.mrf.mxu0 }
  0xf5   : > { %v1754_v12 = vadd.f32 %v1252_v9, %v1719_v50 }
  0xf6   : > { %v453_v10 = vpop.f32.mrf.mxu0 }
  0xf7   : > { %v1168_v15 = vmul.f32 -1.442695, %v1754_v12  ;;  %v1761_v17 = vadd.f32 %v1719_v50, %v453_v10  ;;  %v1162_v10 = vmul.f32 -1.442695, %v1811_v1 }
  0xf8   : > { %v1253_v11 = vpop.f32.mrf.mxu0 }
  0xf9   : > { %v1764_v19 = vadd.f32 %v1253_v11, %v1719_v50  ;;  %1321 = vpow2.f32 %v1168_v15  ;;  %v1166_v23 = vmul.f32 -1.442695, %v1761_v17 }
  0xfa   : > { %v456_v13 = vpop.f32.mrf.mxu0 }
  0xfb   : > { %v1169_v25 = vmul.f32 -1.442695, %v1764_v19  ;;  %1323 = vpow2.f32 %v1166_v23  ;;  %v1800_v55 = vadd.f32 %v1719_v50, %v456_v13  ;;  %v1165_v13 = vmul.f32 -1.442695, %v1748_v6 }
  0xfc   : > { %v1256_v14 = vpop.f32.mrf.mxu0 }
  0xfd   : > { %v1758_v16 = vadd.f32 %v1256_v14, %v1719_v50  ;;  %1325 = vpow2.f32 %v1169_v25  ;;  %v1167_v3 = vmul.f32 -1.442695, %v1800_v55 }
  0xfe   : > { %v469_v18 = vpop.f32.mrf.mxu0 }
  0xff   : > { %v1767_v20 = vadd.f32 %v1719_v50, %v469_v18 }
 0x100   : > { %v1257_v21 = vpop.f32.mrf.mxu0 }
 0x101   : > { %v1770_v22 = vadd.f32 %v1257_v21, %v1719_v50  ;;  %v1160_v21 = vmul.f32 -1.442695, %v1734_v60 }
 0x102   : > { %v472_v24 = vpop.f32.mrf.mxu0 }
 0x103   : > { %v1775_v26 = vadd.f32 %v1719_v50, %v472_v24 }
 0x104   : > { %v1777_v27 = vpop.f32.mrf.mxu0 }
 0x106   : > { %v1779_v28 = vpop.f32.mrf.mxu0  ;;  %v1322_v30 = vpop.eup %1321 }
 0x107   : > { %v674_v31 = vadd.f32 1.0, %v1322_v30  ;;  %v1833_v30 = vadd.f32 %v1777_v27, %v1719_v50  ;;  %v1158_v27 = vmul.f32 -1.442695, %v1737_v62 }
 0x108   : > { %v1781_v29 = vpop.f32.mrf.mxu0  ;;  %v1324_v33 = vpop.eup %1323 }
 0x109   : > { %1327 = vrcp.f32 %v674_v31  ;;  %v672_v37 = vadd.f32 1.0, %v1324_v33  ;;  %v1163_v33 = vmul.f32 -1.442695, %v1751_v8 }
 0x10a   : > { %v1783_v32 = vpop.f32.mrf.mxu0  ;;  %v1326_v35 = vpop.eup %1325 }
 0x10b   : > { %v675_v36 = vadd.f32 1.0, %v1326_v35 }
 0x10c   : > { %v1264_v34 = vpop.f32.mrf.mxu0 }
 0x10d   : > { %1329 = vrcp.f32 %v675_v36  ;;  %v1806_v59 = vadd.f32 %v1264_v34, %v1719_v50 }
 0x10e   : > { %v501_v38 = vpop.f32.mrf.mxu0  ;;  %1331 = vrcp.f32 %v672_v37 }
 0x10f   : > { %v1180_v9 = vmul.f32 -1.442695, %v1806_v59  ;;  %v1822_v4 = vadd.f32 %v1719_v50, %v501_v38 }
 0x110   : > { %v1265_v39 = vpop.f32.mrf.mxu0 }
 0x111   : > { %v1826_v14 = vadd.f32 %v1265_v39, %v1719_v50  ;;  %v1178_v15 = vmul.f32 -1.442695, %v1822_v4  ;;  %v1176_v39 = vmul.f32 -1.442695, %v1833_v30 }
 0x112   : > { %v504_v41 = vpop.f32.mrf.mxu0 }
 0x113   : > { %v1181_v24 = vmul.f32 -1.442695, %v1826_v14  ;;  %v1837_v37 = vadd.f32 %v1719_v50, %v504_v41  ;;  %v1844_v41 = vadd.f32 %v1719_v50, %v1779_v28  ;;  %v1156_v28 = vmul.f32 -1.442695, %v1722_v52 }
 0x114   : > { %v1268_v42 = vpop.f32.mrf.mxu0 }
 0x115   : > { %v1788_v46 = vadd.f32 %v1268_v42, %v1719_v50 }
 0x116   : > { %v1328_v40 = vpop.eup %1327  ;;  %v517_v44 = vpop.f32.mrf.mxu0 }
 0x117   : > { %816 = vrot.lane.b32.xlu0 %v1328_v40, %s1575_s16  ;;  %v1795_v48 = vadd.f32 %v1719_v50, %v517_v44  ;;  %v1184_v51 = vmul.f32 -1.442695, %v1788_v46 }
 0x118   : > { %v1269_v49 = vpop.f32.mrf.mxu0 }
 0x119   : > { %v1803_v57 = vadd.f32 %v1269_v49, %v1719_v50  ;;  %v1182_v61 = vmul.f32 -1.442695, %v1795_v48  ;;  %1333 = vpow2.f32 %v1184_v51 }
 0x11a   : > { %v1330_v43 = vpop.eup %1329  ;;  %v520_v63 = vpop.f32.mrf.mxu0  ;;  %1335 = vpow2.f32 %v1164_v53  ;;  %v1161_v53 = vmul.f32 -1.442695, %v1740_v0 }
 0x11b   : > { %818 = vrot.lane.b32.xlu0 %v1330_v43, %s1575_s16  ;;  %v1332_v45 = vpop.eup %1331  ;;  %v1185_v5 = vmul.f32 -1.442695, %v1803_v57  ;;  %v1816_v7 = vadd.f32 %v1719_v50, %v520_v63  ;;  %1337 = vpow2.f32 %v1182_v61 }
 0x11c   : > { %1339 = vpow2.f32 %v1167_v3  ;;  %v1849_v3 = vadd.f32 %v1781_v29, %v1719_v50 }
 0x11d   : > { %1341 = vpow2.f32 %v1185_v5  ;;  %v1183_v11 = vmul.f32 -1.442695, %v1816_v7 }
 0x11e   : > { %1343 = vpow2.f32 %v1180_v9  ;;  %v1174_v9 = vmul.f32 -1.442695, %v1844_v41 }
 0x11f   : > { %812 = vrot.lane.b32.xlu0 %v1332_v45, %s1575_s16  ;;  %1345 = vpow2.f32 %v1162_v10  ;;  %v1179_v45 = vmul.f32 -1.442695, %v1837_v37 }
 0x120   : > { %1347 = vpow2.f32 %v1183_v11 }
 0x121   : > { %1349 = vpow2.f32 %v1165_v13 }
 0x122   : > { %1351 = vpow2.f32 %v1178_v15 }
 0x126   : > { %v1334_v18 = vpop.eup %1333 }
 0x127   : > { %v1336_v23 = vpop.eup %1335  ;;  %v690_v25 = vadd.f32 1.0, %v1334_v18  ;;  %v1177_v18 = vmul.f32 -1.442695, %v1849_v3 }
 0x128   : > { %v1338_v31 = vpop.eup %1337  ;;  %v670_v34 = vadd.f32 1.0, %v1336_v23 }
 0x129   : > { %1353 = vrcp.f32 %v690_v25  ;;  %v688_v35 = vadd.f32 1.0, %v1338_v31  ;;  %v1340_v36 = vpop.eup %1339 }
 0x12a   : > { %1355 = vpow2.f32 %v1160_v21  ;;  %v1342_v38 = vpop.eup %1341  ;;  %v673_v43 = vadd.f32 1.0, %v1340_v36 }
 0x12b   : > { %1357 = vpow2.f32 %v1181_v24  ;;  %v1344_v40 = vpop.eup %1343  ;;  %v691_v42 = vadd.f32 1.0, %v1342_v38  ;;  %v1159_v24 = vmul.f32 -1.442695, %v1743_v2  ;;  %v1172_v38 = vmul.f32 -1.442695, %v1758_v16 }
 0x12c   : > { %1359 = vrcp.f32 %v688_v35  ;;  %v1346_v44 = vpop.eup %1345  ;;  %v686_v51 = vadd.f32 1.0, %v1344_v40  ;;  %v1154_v40 = vmul.f32 -1.442695, %v1725_v54 }
 0x12d   : > { %1361 = vpow2.f32 %v1163_v33  ;;  %v1348_v49 = vpop.eup %1347  ;;  %v668_v61 = vadd.f32 1.0, %v1346_v44 }
 0x12e   : > { %1363 = vrcp.f32 %v670_v34  ;;  %v1350_v63 = vpop.eup %1349  ;;  %v689_v5 = vadd.f32 1.0, %v1348_v49  ;;  %v1859_v34 = vadd.f32 %v1719_v50, %v1783_v32  ;;  %v1157_v49 = vmul.f32 -1.442695, %v1728_v56 }
 0x12f   : > { %1365 = vrcp.f32 %v691_v42  ;;  %v1352_v10 = vpop.eup %1351  ;;  %v671_v13 = vadd.f32 1.0, %v1350_v63 }
 0x130   : > { %1367 = vpow2.f32 %v1176_v39  ;;  %v684_v21 = vadd.f32 1.0, %v1352_v10  ;;  %v1175_v50 = vmul.f32 -1.442695, %v1859_v34 }
 0x131   : > { %1369 = vpow2.f32 %v1158_v27 }
 0x132   : > { %1371 = vrcp.f32 %v673_v43 }
 0x133   : > { %1373 = vpow2.f32 %v1179_v45 }
 0x134   : > { %1375 = vrcp.f32 %v686_v51 }
 0x135   : > { %1377 = vpow2.f32 %v1161_v53 }
 0x136   : > { %v1354_v11 = vpop.eup %1353  ;;  %1379 = vrcp.f32 %v668_v61 }
 0x137   : > { %v1356_v15 = vpop.eup %1355  ;;  %1381 = vrcp.f32 %v689_v5  ;;  %848 = vrot.lane.b32.xlu1 %v1354_v11, %s1575_s16 }
 0x138   : > { %v1358_v29 = vpop.eup %1357  ;;  %1383 = vpow2.f32 %v1174_v9  ;;  %v666_v31 = vadd.f32 1.0, %v1356_v15  ;;  %v1170_v9 = vmul.f32 -1.442695, %v1767_v20  ;;  %v1173_v15 = vmul.f32 -1.442695, %v1770_v22 }
 0x139   : > { %v1360_v23 = vpop.eup %1359  ;;  %1385 = vpow2.f32 %v1156_v28  ;;  %v687_v35 = vadd.f32 1.0, %v1358_v29 }
 0x13a   : > { %v1362_v25 = vpop.eup %1361  ;;  %1387 = vrcp.f32 %v671_v13  ;;  %844 = vrot.lane.b32.xlu0 %v1360_v23, %s1575_s16 }
 0x13b   : > { %v1364_v33 = vpop.eup %1363  ;;  %1389 = vpow2.f32 %v1177_v18  ;;  %v669_v42 = vadd.f32 1.0, %v1362_v25 }
 0x13c   : > { %v1366_v36 = vpop.eup %1365  ;;  %1391 = vrcp.f32 %v684_v21 }
 0x13d   : > { %v1368_v39 = vpop.eup %1367  ;;  %1393 = vpow2.f32 %v1159_v24  ;;  %850 = vrot.lane.b32.xlu1 %v1366_v36, %s1575_s16  ;;  %v1155_v24 = vmul.f32 -1.442695, %v1731_v58 }
 0x13e   : > { %v1370_v27 = vpop.eup %1369  ;;  %1395 = vrcp.f32 %v666_v31  ;;  %808 = vrot.lane.b32.xlu0 %v1364_v33, %s1575_s16  ;;  %v682_v44 = vadd.f32 1.0, %v1368_v39 }
 0x13f   : > { %v1372_v43 = vpop.eup %1371  ;;  %1397 = vrcp.f32 %v687_v35  ;;  %v664_v53 = vadd.f32 1.0, %v1370_v27  ;;  %v1171_v27 = vmul.f32 -1.442695, %v1775_v26 }
 0x140   : > { %v1374_v32 = vpop.eup %1373  ;;  %1399 = vpow2.f32 %v1172_v38 }
 0x141   : > { %v1376_v45 = vpop.eup %1375  ;;  %1401 = vpow2.f32 %v1154_v40  ;;  %814 = vrot.lane.b32.xlu1 %v1372_v43, %s1575_s16  ;;  %v685_v63 = vadd.f32 1.0, %v1374_v32 }
 0x142   : > { %v1378_v51 = vpop.eup %1377  ;;  %1403 = vrcp.f32 %v669_v42  ;;  %840 = vrot.lane.b32.xlu0 %v1376_v45, %s1575_s16 }
 0x143   : > { %v1380_v61 = vpop.eup %1379  ;;  %1405 = vpow2.f32 %v1175_v50  ;;  %v667_v11 = vadd.f32 1.0, %v1378_v51 }
 0x144   : > { %v1382_v5 = vpop.eup %1381  ;;  %1407 = vrcp.f32 %v682_v44 }
 0x145   : > { %v1384_v10 = vpop.eup %1383  ;;  %1409 = vpow2.f32 %v1157_v49  ;;  %846 = vrot.lane.b32.xlu1 %v1382_v5, %s1575_s16 }
 0x146   : > { %v1386_v28 = vpop.eup %1385  ;;  %1411 = vrcp.f32 %v664_v53  ;;  %804 = vrot.lane.b32.xlu0 %v1380_v61, %s1575_s16  ;;  %v680_v29 = vadd.f32 1.0, %v1384_v10 }
 0x147   : > { %v1388_v13 = vpop.eup %1387  ;;  %1413 = vrcp.f32 %v685_v63  ;;  %v662_v35 = vadd.f32 1.0, %v1386_v28 }
 0x148   : > { %v1390_v18 = vpop.eup %1389  ;;  %1415 = vpow2.f32 %v1170_v9 }
 0x149   : > { %v1392_v21 = vpop.eup %1391  ;;  %810 = vrot.lane.b32.xlu1 %v1388_v13, %s1575_s16  ;;  %1417 = vrcp.f32 %v667_v11  ;;  %v683_v31 = vadd.f32 1.0, %v1390_v18 }
 0x14a   : > { %v1394_v23 = vpop.eup %1393  ;;  %836 = vrot.lane.b32.xlu0 %v1392_v21, %s1575_s16  ;;  %1419 = vpow2.f32 %v1173_v15 }
 0x14b   : > { %v1396_v25 = vpop.eup %1395  ;;  %1421 = vrcp.f32 %v680_v29  ;;  %v665_v39 = vadd.f32 1.0, %v1394_v23 }
 0x14c   : > { %v1398_v33 = vpop.eup %1397  ;;  %1423 = vpow2.f32 %v1155_v24 }
 0x14d   : > { %v1400_v36 = vpop.eup %1399  ;;  %842 = vrot.lane.b32.xlu1 %v1398_v33, %s1575_s16  ;;  %1425 = vrcp.f32 %v683_v31 }
 0x14e   : > { %v1402_v38 = vpop.eup %1401  ;;  %800 = vrot.lane.b32.xlu0 %v1396_v25, %s1575_s16  ;;  %1427 = vrcp.f32 %v662_v35  ;;  %v678_v43 = vadd.f32 1.0, %v1400_v36 }
 0x14f   : > { %v1404_v40 = vpop.eup %1403  ;;  %1429 = vrcp.f32 %v665_v39  ;;  %v660_v51 = vadd.f32 1.0, %v1402_v38  ;;  %v1897_v38 = vld [vmem:[%s2007_s3] sm:$0x1] }
 0x150   : > { %v1406_v42 = vpop.eup %1405  ;;  %1431 = vpow2.f32 %v1171_v27  ;;  %1232 = vmatprep.mubr.msk.bf16.mxu1 %vm933_vm1, %v1897_v38  ;;  %v1028_v27 = vld [vmem:[%s2008_s4] sm:$0x3] }
 0x151   : > { %v1408_v50 = vpop.eup %1407  ;;  %806 = vrot.lane.b32.xlu1 %v1404_v40, %s1575_s16  ;;  %v681_v45 = vadd.f32 1.0, %v1406_v42  ;;  %1433 = vrcp.f32 %v678_v43  ;;  %v1576_v42 = vmov 0  }
 0x152   : > { %v1410_v32 = vpop.eup %1409  ;;  %832 = vrot.lane.b32.xlu0 %v1408_v50, %s1575_s16 }
 0x153   : > { %v1412_v44 = vpop.eup %1411  ;;  %v663_v63 = vadd.f32 1.0, %v1410_v32  ;;  %1435 = vrcp.f32 %v681_v45  ;;  %1318 = vset.pattern.permute.xlu0 %v1576_v42 }
 0x154   : > { %v1414_v49 = vpop.eup %1413  ;;  %1437 = vrcp.f32 %v660_v51 }
 0x155   : > { %v1416_v53 = vpop.eup %1415  ;;  %838 = vrot.lane.b32.xlu1 %v1414_v49, %s1575_s16  ;;  %1439 = vrcp.f32 %v663_v63 }
 0x156   : > { %796 = vrot.lane.b32.xlu0 %v1412_v44, %s1575_s16  ;;  %v1418_v61 = vpop.eup %1417  ;;  %v676_v9 = vadd.f32 1.0, %v1416_v53 }
 0x157   : > { %v1420_v5 = vpop.eup %1419 }
 0x158   : > { %v1422_v10 = vpop.eup %1421  ;;  %v679_v11 = vadd.f32 1.0, %v1420_v5  ;;  %1441 = vrcp.f32 %v676_v9 }
 0x159   : > { %802 = vrot.lane.b32.xlu1 %v1418_v61, %s1575_s16  ;;  %v1424_v28 = vpop.eup %1423 }
 0x15a   : > { %828 = vrot.lane.b32.xlu0 %v1422_v10, %s1575_s16  ;;  %v1426_v13 = vpop.eup %1425  ;;  %v661_v29 = vadd.f32 1.0, %v1424_v28  ;;  %1443 = vrcp.f32 %v679_v11 }
 0x15b   : > { %v1428_v15 = vpop.eup %1427 }
 0x15c   : > { %v1430_v18 = vpop.eup %1429  ;;  %1445 = vrcp.f32 %v661_v29 }
 0x15d   : > { %834 = vrot.lane.b32.xlu1 %v1426_v13, %s1575_s16  ;;  %v1432_v21 = vpop.eup %1431 }
 0x15e   : > { %792 = vrot.lane.b32.xlu0 %v1428_v15, %s1575_s16  ;;  %v1434_v23 = vpop.eup %1433  ;;  %v677_v24 = vadd.f32 1.0, %v1432_v21 }
 0x160   : > { %v1436_v25 = vpop.eup %1435  ;;  %1447 = vrcp.f32 %v677_v24 }
 0x161   : > { %798 = vrot.lane.b32.xlu1 %v1430_v18, %s1575_s16  ;;  %v1438_v31 = vpop.eup %1437  ;;  %1449 = vtanh.f32 %v1754_v12 }
 0x162   : > { %824 = vrot.lane.b32.xlu0 %v1434_v23, %s1575_s16  ;;  %v1440_v33 = vpop.eup %1439  ;;  %1451 = vtanh.f32 %v1764_v19 }
 0x163   : > { %1453 = vtanh.f32 %v1788_v46 }
 0x164   : > { %1455 = vtanh.f32 %v1803_v57 }
 0x165   : > { %830 = vrot.lane.b32.xlu1 %v1436_v25, %s1575_s16  ;;  %v1442_v35 = vpop.eup %1441  ;;  %1457 = vtanh.f32 %v1761_v17 }
 0x166   : > { %788 = vrot.lane.b32.xlu0 %v1438_v31, %s1575_s16  ;;  %1459 = vtanh.f32 %v1800_v55 }
 0x167   : > { %v1444_v36 = vpop.eup %1443  ;;  %1461 = vtanh.f32 %v1795_v48 }
 0x168   : > { %1463 = vtanh.f32 %v1816_v7 }
 0x169   : > { %794 = vrot.lane.b32.xlu1 %v1440_v33, %s1575_s16  ;;  %v1446_v39 = vpop.eup %1445  ;;  %1465 = vtanh.f32 %v1791_v47 }
 0x16a   : > { %820 = vrot.lane.b32.xlu0 %v1442_v35, %s1575_s16  ;;  %1467 = vtanh.f32 %v1748_v6 }
 0x16b   : > { %1469 = vtanh.f32 %v1806_v59 }
 0x16c   : > { %1471 = vtanh.f32 %v1826_v14 }
 0x16d   : > { %826 = vrot.lane.b32.xlu1 %v1444_v36, %s1575_s16  ;;  %v1448_v40 = vpop.eup %1447  ;;  %1473 = vtanh.f32 %v1811_v1 }
 0x16e   : > { %1031 = vperm.xlu0 %1318, %v1028_v27   ;;  %v1450_v50 = vpop.eup %1449  ;;  %1475 = vtanh.f32 %v1751_v8 }
 0x16f   : > { %v1452_v32 = vpop.eup %1451  ;;  %1477 = vtanh.f32 %v1822_v4 }
 0x170   : > { %v1454_v61 = vpop.eup %1453  ;;  %1479 = vtanh.f32 %v1837_v37 }
 0x171   : > { %790 = vrot.lane.b32.xlu1 %v1446_v39, %s1575_s16  ;;  %v1456_v63 = vpop.eup %1455  ;;  %1481 = vtanh.f32 %v1734_v60 }
 0x172   : > { %v1458_v17 = vpop.eup %1457  ;;  %1483 = vtanh.f32 %v1740_v0 }
 0x173   : > { %v1460_v55 = vpop.eup %1459  ;;  %1485 = vtanh.f32 %v1833_v30 }
 0x174   : > { %v1462_v11 = vpop.eup %1461  ;;  %1487 = vtanh.f32 %v1849_v3 }
 0x175   : > { %822 = vrot.lane.b32.xlu1 %v1448_v40, %s1575_s16  ;;  %v1464_v13 = vpop.eup %1463  ;;  %1489 = vtanh.f32 %v1737_v62 }
 0x176   : > { %v1466_v21 = vpop.eup %1465  ;;  %1491 = vtanh.f32 %v1743_v2 }
 0x177   : > { %v1468_v24 = vpop.eup %1467  ;;  %1493 = vtanh.f32 %v1844_v41 }
 0x178   : > { %v1470_v35 = vpop.eup %1469  ;;  %1495 = vtanh.f32 %v1859_v34 }
 0x179   : > { %v1472_v36 = vpop.eup %1471  ;;  %1497 = vtanh.f32 %v1722_v52 }
 0x17a   : > { %v1474_v42 = vpop.eup %1473  ;;  %1499 = vtanh.f32 %v1728_v56 }
 0x17b   : > { %1501 = vtanh.f32 %v1758_v16 }
 0x17c   : > { %1503 = vtanh.f32 %v1770_v22 }
 0x17d   : > { %1505 = vtanh.f32 %v1725_v54 }
 0x189   : > { %v817_v43 = vpop.permute.xlu0 %816 }
 0x18a   : > { %v898_v45 = vmul.f32 %v1450_v50, %v817_v43  ;;  %v1476_v50 = vpop.eup %1475  ;;  %1507 = vtanh.f32 %v1731_v58 }
 0x18d   : > { %v819_v44 = vpop.permute.xlu0 %818 }
 0x18e   : > { %v899_v49 = vmul.f32 %v1452_v32, %v819_v44 }
 0x190   : > { %v923_v51 = vpack.c.bf16 %v899_v49, %v898_v45  ;;  %v1478_v49 = vpop.eup %1477  ;;  %1509 = vtanh.f32 %v1767_v20 }
 0x191   : > { %v813_v12 = vpop.permute.xlu0 %812 }
 0x192   : > { %v896_v7 = vmul.f32 %v1458_v17, %v813_v12  ;;  %v959_v47 = vsel %vm933_vm1, %v923_v51, 0  ;;  %v1480_v51 = vpop.eup %1479  ;;  %1511 = vtanh.f32 %v1775_v26 }
 0x1a9   : > { %v849_v19 = vpop.permute.xlu1 %848 }
 0x1aa   : > { %v914_v5 = vmul.f32 %v1454_v61, %v849_v19  ;;  %v1482_v61 = vpop.eup %1481 }
 0x1ac   : > { %v845_v53 = vpop.permute.xlu0 %844 }
 0x1ad   : > { %v912_v14 = vmul.f32 %v1462_v11, %v845_v53 }
 0x1af   : > { %v851_v46 = vpop.permute.xlu1 %850 }
 0x1b0   : > { %v915_v57 = vmul.f32 %v1456_v63, %v851_v46  ;;  %v809_v9 = vpop.permute.xlu0 %808  ;;  %v1484_v46 = vpop.eup %1483 }
 0x1b1   : > { %v894_v31 = vmul.f32 %v1466_v21, %v809_v9  ;;  %v1486_v17 = vpop.eup %1485 }
 0x1b2   : > { %v931_v48 = vpack.c.bf16 %v915_v57, %v914_v5 }
 0x1b3   : > { %v815_v10 = vpop.permute.xlu1 %814 }
 0x1b4   : > { %v897_v28 = vmul.f32 %v1460_v55, %v815_v10  ;;  %1270 = vmatprep.subr.msk.bf16.mxu1 %vm933_vm1, %v931_v48  ;;  %v841_v6 = vpop.permute.xlu0 %840  ;;  %v1488_v48 = vpop.eup %1487 }
 0x1b5   : > { %1217 = vmatpush3.bf16.xpose.msra.mxu1 %v959_v47  ;;  %v910_v37 = vmul.f32 %v1470_v35, %v841_v6 }
 0x1b6   : > { %v922_v59 = vpack.c.bf16 %v897_v28, %v896_v7  ;;  %v1490_v7 = vpop.eup %1489 }
 0x1b7   : > { %v847_v15 = vpop.permute.xlu1 %846  ;;  %v1492_v47 = vpop.eup %1491 }
 0x1b8   : > { %v913_v18 = vmul.f32 %v1464_v13, %v847_v15  ;;  %v805_v29 = vpop.permute.xlu0 %804  ;;  %v956_v8 = vsel %vm933_vm1, %v922_v59, 0  ;;  %v1494_v13 = vpop.eup %1493 }
 0x1b9   : > { %v892_v44 = vmul.f32 %v1474_v42, %v805_v29  ;;  %v1496_v15 = vpop.eup %1495 }
 0x1ba   : > { %v930_v23 = vpack.c.bf16 %v913_v18, %v912_v14  ;;  %v1498_v21 = vpop.eup %1497 }
 0x1bb   : > { %v811_v25 = vpop.permute.xlu1 %810 }
 0x1bc   : > { %v895_v1 = vmul.f32 %v1468_v24, %v811_v25  ;;  %1271 = vmatprep.subr.msk.bf16.mxu1 %vm933_vm1, %v930_v23  ;;  %v837_v33 = vpop.permute.xlu0 %836  ;;  %v1500_v24 = vpop.eup %1499 }
 0x1bd   : > { %1219 = vmatpush3.bf16.xpose.msra.mxu1 %v956_v8  ;;  %v908_v3 = vmul.f32 %v1478_v49, %v837_v33 }
 0x1be   : > { %v921_v4 = vpack.c.bf16 %v895_v1, %v894_v31  ;;  %v1502_v1 = vpop.eup %1501 }
 0x1bf   : > { %v843_v39 = vpop.permute.xlu1 %842  ;;  %v1504_v33 = vpop.eup %1503 }
 0x1c0   : > { %v911_v40 = vmul.f32 %v1472_v36, %v843_v39  ;;  %v801_v27 = vpop.permute.xlu0 %800  ;;  %v953_v0 = vsel %vm933_vm1, %v921_v4, 0  ;;  %v1506_v39 = vpop.eup %1505 }
 0x1c1   : > { %v890_v57 = vmul.f32 %v1482_v61, %v801_v27  ;;  %v1508_v26 = vpop.eup %1507 }
 0x1c2   : > { %v929_v43 = vpack.c.bf16 %v911_v40, %v910_v37 }
 0x1c3   : > { %v807_v32 = vpop.permute.xlu1 %806 }
 0x1c4   : > { %v893_v60 = vmul.f32 %v1476_v50, %v807_v32  ;;  %1272 = vmatprep.subr.msk.bf16.mxu1 %vm933_vm1, %v929_v43  ;;  %v833_v45 = vpop.permute.xlu0 %832  ;;  %v1510_v32 = vpop.eup %1509 }
 0x1c5   : > { %1221 = vmatpush3.bf16.xpose.msra.mxu1 %v953_v0  ;;  %v906_v34 = vmul.f32 %v1486_v17, %v833_v45 }
 0x1c6   : > { %v920_v30 = vpack.c.bf16 %v893_v60, %v892_v44  ;;  %v1512_v60 = vpop.eup %1511 }
 0x1c7   : > { %v839_v12 = vpop.permute.xlu1 %838 }
 0x1c8   : > { %v909_v19 = vmul.f32 %v1480_v51, %v839_v12  ;;  %v797_v53 = vpop.permute.xlu0 %796  ;;  %v950_v2 = vsel %vm933_vm1, %v920_v30, 0 }
 0x1c9   : > { %v888_v52 = vmul.f32 %v1490_v7, %v797_v53 }
 0x1ca   : > { %v928_v63 = vpack.c.bf16 %v909_v19, %v908_v3 }
 0x1cb   : > { %v803_v5 = vpop.permute.xlu1 %802 }
 0x1cc   : > { %v891_v62 = vmul.f32 %v1484_v46, %v803_v5  ;;  %1273 = vmatprep.subr.msk.bf16.mxu1 %vm933_vm1, %v928_v63  ;;  %v829_v9 = vpop.permute.xlu0 %828 }
 0x1cd   : > { %1223 = vmatpush3.bf16.xpose.msra.mxu1 %v950_v2  ;;  %v904_v22 = vmul.f32 %v1494_v13, %v829_v9 }
 0x1ce   : > { %v919_v41 = vpack.c.bf16 %v891_v62, %v890_v57 }
 0x1cf   : > { %v835_v55 = vpop.permute.xlu1 %834 }
 0x1d0   : > { %v907_v10 = vmul.f32 %v1488_v48, %v835_v55  ;;  %v793_v6 = vpop.permute.xlu0 %792  ;;  %v947_v56 = vsel %vm933_vm1, %v919_v41, 0 }
 0x1d1   : > { %v886_v31 = vmul.f32 %v1498_v21, %v793_v6 }
 0x1d2   : > { %v927_v28 = vpack.c.bf16 %v907_v10, %v906_v34 }
 0x1d3   : > { %v799_v11 = vpop.permute.xlu1 %798 }
 0x1d4   : > { %v889_v59 = vmul.f32 %v1492_v47, %v799_v11  ;;  %1274 = vmatprep.subr.msk.bf16.mxu1 %vm933_vm1, %v927_v28  ;;  %v825_v29 = vpop.permute.xlu0 %824 }
 0x1d5   : > { %1225 = vmatpush3.bf16.xpose.msra.mxu1 %v947_v56  ;;  %v902_v20 = vmul.f32 %v1502_v1, %v825_v29 }
 0x1d6   : > { %v918_v16 = vpack.c.bf16 %v889_v59, %v888_v52 }
 0x1d7   : > { %v831_v14 = vpop.permute.xlu1 %830 }
 0x1d8   : > { %v905_v18 = vmul.f32 %v1496_v15, %v831_v14  ;;  %v944_v58 = vsel %vm933_vm1, %v918_v16, 0  ;;  %v789_v35 = vpop.permute.xlu0 %788 }
 0x1d9   : > { %v884_v27 = vmul.f32 %v1506_v39, %v789_v35 }
 0x1da   : > { %v926_v23 = vpack.c.bf16 %v905_v18, %v904_v22 }
 0x1db   : > { %v795_v25 = vpop.permute.xlu1 %794 }
 0x1dc   : > { %v887_v54 = vmul.f32 %v1500_v24, %v795_v25  ;;  %1275 = vmatprep.subr.msk.bf16.mxu1 %vm933_vm1, %v926_v23  ;;  %v821_v50 = vpop.permute.xlu0 %820 }
 0x1dd   : > { %1227 = vmatpush3.bf16.xpose.msra.mxu1 %v944_v58  ;;  %v900_v45 = vmul.f32 %v1510_v32, %v821_v50 }
 0x1de   : > { %v917_v8 = vpack.c.bf16 %v887_v54, %v886_v31 }
 0x1df   : > { %v827_v4 = vpop.permute.xlu1 %826 }
 0x1e0   : > { %v903_v36 = vmul.f32 %v1504_v33, %v827_v4  ;;  %v941_v43 = vsel %vm933_vm1, %v917_v8, 0 }
 0x1e2   : > { %v925_v37 = vpack.c.bf16 %v903_v36, %v902_v20 }
 0x1e3   : > { %v791_v40 = vpop.permute.xlu1 %790 }
 0x1e4   : > { %v885_v42 = vmul.f32 %v1508_v26, %v791_v40  ;;  %1276 = vmatprep.subr.msk.bf16.mxu1 %vm933_vm1, %v925_v37 }
 0x1e5   : > { %1229 = vmatpush3.bf16.xpose.msra.mxu1 %v941_v43 }
 0x1e6   : > { %v916_v44 = vpack.c.bf16 %v885_v42, %v884_v27 }
 0x1e7   : > { %v823_v0 = vpop.permute.xlu1 %822 }
 0x1e8   : > { %v901_v49 = vmul.f32 %v1512_v60, %v823_v0  ;;  %v938_v51 = vsel %vm933_vm1, %v916_v44, 0 }
 0x1e9   : > { %v1032_v19 = vpop.permute.xlu0 %1031 }
 0x1ea   : > { %v924_v30 = vpack.c.bf16 %v901_v49, %v900_v45 }
 0x1ec   : > { %1277 = vmatprep.subr.msk.bf16.mxu1 %vm933_vm1, %v924_v30 }
 0x1ed   : > { %1231 = vmatpush3.bf16.xpose.msra.mxu1 %v938_v51 }
 0x1f4   : > { %1233 = vmatmul.mubr.msk.bf16.vlgmr.msra.gmra.mxu1 %vm933_vm1, %v1897_v38 }
 0x2b4   : > { %v1019_v12 = vpop.f32.mrf.mxu1 }
 0x2b5   : > { %v1026_v3 = vmul.f32 0.25, %v1019_v12 }
 0x2b6   : > { %v1021_v53 = vpop.f32.mrf.mxu1 }
 0x2b7   : > { %v1027_v61 = vmul.f32 0.25, %v1021_v53  ;;  %v1034_v46 = vadd.f32 %v1032_v19, %v1026_v3 }
 0x2b8   : > { %v1023_v63 = vpop.f32.mrf.mxu1 }
 0x2b9   : > { %v1035_v5 = vadd.f32 %v1032_v19, %v1027_v61  ;;  %1055 = sbr.rel (!%p1646_p5) target bundleno = 728 (0x2d8), region = 44 }
 0x2ba   : > { %v1024_v57 = vpop.f32.mrf.mxu1 }
 0x2bb   : > { %v1038_v62 = vcombine.low %v1034_v46, %v1035_v5 }
 0x2bd   : > { %1187 = vst.sshfl [vmem:[%s230_s7] sm:$0x33 pattern:$0x76325410] %v1038_v62 }
 0x2be   : > { %s2019_s10 = smov (!%p1058_p11, %s1057_s10), 2 }
 0x2bf   : > { %s1962_s11 = sshll.u32 %s2019_s10, 5 }
 0x2c0   : > { %s1062_s12 = ssub.s32 64, %s1962_s11 }
 0x2c1   : > { %1063 = vsyncadd %s1957_s8, %s1062_s12  ;;  %p1191_p12 = scmp.ne.s32.totalorder %s1962_s11, 0  ;;  %s1197_s13 = sshll.u32 %s1629_s22, 6 }
 0x2c2   : > { %s1066_s15 = scalar_lea.hbm %s2009_s5, %s1197_s13  ;;  %s1069_s16 = sshll.u32 %s230_s7, 4  ;;  %s1070_s16 = int_to_ptr.vmem [resolvable:$true] %s1069_s16 }
 0x2c3   : > { %s1513_s17 = scalar_lea.vmem %s1070_s16, %s1962_s11  ;;  %s1577_s23 = smov [#allocation2]  }
 0x2c4   : > { %p1514_p13 = scmp.ne.s32.totalorder %s1070_s16, %s1513_s17  ;;  %s1517_s25 = sshll.u32 %s1577_s23, 4  ;;  %s1518_s25 = int_to_ptr.vmem [resolvable:$false] %s1517_s25 }
 0x2c5   : > { %s1519_s26 = scalar_lea.vmem %s1518_s25, 128  ;;  %p1520_p2 = scmp.lt.s32.totalorder %s1070_s16, %s1518_s25 }
 0x2c6   : > { %p1515_p0 = pnand %p1514_p13, %p1191_p12  ;;  %p1521_p3 = scmp.lt.s32.totalorder %s1519_s26, %s1513_s17 }
 0x2c8   : > { %p1516_p1 = pneg %p1515_p0  ;;  %p1522_p4 = por %p1521_p3, %p1520_p2 }
 0x2ca   : > { %p1523_p5 = pnand %p1522_p4, %p1516_p1 }
 0x2cc   : > { %1526 = shalt.err (!%p1523_p5)
}
 0x2cd   : > { %s1527_s22 = scalar_lea.hbm %s1066_s15, %s1962_s11  ;;  %s1531_s7 = scalar_lea.hbm %s2009_s5, 96 }
 0x2ce   : > { %p1528_p7 = scmp.ne.s32.totalorder %s1066_s15, %s1527_s22  ;;  %p1532_p10 = scmp.lt.s32.totalorder %s1066_s15, %s2009_s5 }
 0x2cf   : > { %p1533_p11 = scmp.lt.s32.totalorder %s1531_s7, %s1527_s22 }
 0x2d0   : > { %p1529_p8 = pnand %p1528_p7, %p1191_p12 }
 0x2d1   : > { %p1534_p13 = por %p1533_p11, %p1532_p10 }
 0x2d2   : > { %p1530_p9 = pneg %p1529_p8 }
 0x2d4   : > { %p1535_p0 = pnand %p1534_p13, %p1530_p9 }
 0x2d6   : > { %1538 = shalt.err (!%p1535_p0)
}
 0x2d7   : > { %1072 = dma.vmem_to_hbm [thread:$0]  (%p1191_p12), %s1070_s16, %s1962_s11, %s1066_s15, %s1957_s8  }
 0x2d8 PF: > { %p1283_p1 = scmp.ge.s32.totalorder %s1573_s21, 2  ;;  %s1081_s12 = sand.u32 1, %s1561_s18  }
 0x2d9   : > { %s1082_s13 = scalar_lea.sflag [#allocation3], %s1081_s12 }
 0x2da   : > { %p1280_p2 = pnand %p1283_p1, %p1650_p6 }
 0x2dc   : > { %p1281_p3 = pneg %p1280_p2 }
 0x2de   : > { %1556 = dma.done.wait (%p1281_p3), %s1082_s13, 64  }
 0x2df   : > { %1558 = vsyncadd (%p1281_p3), %s1082_s13, 4294967232  ;;  %p15_p4 = scmp.ge.s32.totalorder %s1633_s24, 4   ;;  %s2012_s18 = smov %s1565_s19 }
 0x2e0   : > { %s2013_s19 = smov %s1569_s20  ;;  %s2014_s20 = smov %s1644_s27 }
 0x2e1   : > { %s2015_s21 = smov %s1633_s24  ;;  %17 = sbr.rel (!%p15_p4) target bundleno = 3 (0x3), region = 75 }
 0x2e6   :  { %1087 = vsyncpa [#allocation3], 1 }
 0x2e7   :  { %1089 = vsyncpa [#allocation3 + $0x1], 1 }

</bundles_post_ra>
